<compile_context>
chip_gen: v6e
topology: v6e:2x2x1
jax: 0.10.0
libtpu: 0.0.40
codegen_flags: <defaults>
</compile_context>

<pallas_src>
import random

import jax
import jax.numpy as jnp
from jax import lax
from jax.experimental import pallas as pl
from jax.experimental.pallas import tpu as pltpu


# ---------------------------------------------------------------------------
# Pallas kernel factory (drop flags are Python-static, so dropped inputs are
# removed from the signature / DMA list entirely).
# ---------------------------------------------------------------------------
def _make_cfm_kernel(drop_audio_cond: bool, drop_text: bool, tn: int):
    def kernel(lens_ref, time_ref, *refs):
        it = iter(refs)
        x1_ref = next(it)
        x0_ref = next(it)
        cond_ref = None if drop_audio_cond else next(it)
        text_ref = None if drop_text else next(it)
        bias_ref = next(it)
        win_ref = next(it)
        wout_ref = next(it)
        pred_ref = next(it)
        loss_ref = next(it)

        b = pl.program_id(0)
        s = pl.program_id(1)

        t = time_ref[b]                              # f32 scalar from SMEM
        x1 = x1_ref[0]                               # (TN, D_MEL) f32
        x0 = x0_ref[0]

        # CFM interpolation (f32 elementwise hot path).
        phi = (1.0 - t) * x0 + t * x1
        flow = x1 - x0

        # Fused input matmul: [phi | cond] @ [Wx; Wc] — single MXU pass.
        xin = phi.astype(jnp.bfloat16)
        if not drop_audio_cond:
            xin = jnp.concatenate([xin, cond_ref[0]], axis=-1)   # (TN, 2*D_MEL)
        h = jnp.dot(xin, win_ref[...], preferred_element_type=jnp.float32)

        # Sequence-invariant bias (spk@Ws + t*wt + bt), hoisted to the wrapper.
        h = h + bias_ref[0]                          # (1, DIM) broadcast add
        if not drop_text:
            h = h + text_ref[0].astype(jnp.float32)
        h = jnp.tanh(h)

        pred = jnp.dot(h.astype(jnp.bfloat16), wout_ref[...],
                       preferred_element_type=jnp.float32)
        pred_ref[0] = pred.astype(pred_ref.dtype)

        # Masked MSE partial sum; mask built in-kernel from SMEM `lens`.
        row = lax.broadcasted_iota(jnp.int32, (tn, 1), 0) + s * tn
        valid = row < lens_ref[b]                    # (TN, 1) bool
        diff = pred - flow
        sq = jnp.where(valid, diff * diff, 0.0)
        loss_ref[0] = jnp.sum(sq, axis=0, keepdims=True)         # (1, D_MEL)

    return kernel


# ---------------------------------------------------------------------------
# Wrapper (mirrors CodecCFM.forward). Returns (loss_mean, ref_mel, pred, aux).
# ---------------------------------------------------------------------------
def codec_cfm_forward(inp, codec, spk, ref_mel, params, lens=None, *,
                      audio_drop_prob=0.3, cond_drop_prob=0.2, repeats=2,
                      key=None, seq_tile=256, force_drop=None):
    B, N, D_MEL = inp.shape
    DIM = params["wx"].shape[1]

    if key is None:
        key = jax.random.PRNGKey(0)
    k_x0, k_t = jax.random.split(key, 2)

    if lens is None:
        lens = jnp.full((B,), N, dtype=jnp.int32)
    lens = lens.astype(jnp.int32)

    x1 = inp.astype(jnp.float32)
    x0 = jax.random.normal(k_x0, x1.shape, dtype=jnp.float32)            # randn_like
    time = jax.nn.sigmoid(jax.random.normal(k_t, (B,), dtype=jnp.float32))  # logit-normal

    # Codec embedding gather + repeat_interleave to sequence length (JAX glue).
    emb = params["codec_emb"][codec].sum(axis=-2)                        # (B, NC, DIM)
    text_emb = jnp.repeat(emb, repeats, axis=1)                          # (B, N, DIM)
    assert text_emb.shape[1] == N

    # CFM drop flags: Python-static (PyTorch forward uses the python `random` module).
    if force_drop is None:
        prng = random.Random(0)
        drop_audio_cond = prng.random() < audio_drop_prob
        if prng.random() < cond_drop_prob:
            drop_audio_cond, drop_text = True, True
        else:
            drop_text = False
    else:
        drop_audio_cond, drop_text = force_drop

    # Sequence-invariant per-batch bias hoisted out of the kernel:
    #   spk @ Ws + time * wt + bt   -> (B, 1, DIM)
    bias = (spk.astype(jnp.float32) @ params["ws"]
            + time[:, None] * params["wt"][0][None, :]
            + params["bt"][0][None, :]).reshape(B, 1, DIM)

    # bf16 MXU operands (f32 accumulation inside the kernel).
    cond_bf = ref_mel.astype(jnp.bfloat16)
    text_bf = text_emb.astype(jnp.bfloat16)
    if drop_audio_cond:
        win_bf = params["wx"].astype(jnp.bfloat16)                       # (D_MEL, DIM)
    else:
        win_bf = jnp.concatenate([params["wx"], params["wc"]],
                                 axis=0).astype(jnp.bfloat16)            # (2*D_MEL, DIM)
    wout_bf = params["wout"].astype(jnp.bfloat16)                        # (DIM, D_MEL)

    # Grid: (batch, seq tiles). Sequence tiled to bound per-step VMEM.
    TN = N if N <= seq_tile else seq_tile
    S = pl.cdiv(N, TN)

    kernel = _make_cfm_kernel(drop_audio_cond, drop_text, TN)

    def smem_spec():
        return pl.BlockSpec(memory_space=pltpu.MemorySpace.SMEM)

    def seq_spec(d):
        return pl.BlockSpec((1, TN, d), lambda b, s: (b, s, 0))

    def full_spec(arr):
        return pl.BlockSpec(arr.shape, lambda b, s: (0, 0))

    in_specs = [smem_spec(), smem_spec(), seq_spec(D_MEL), seq_spec(D_MEL)]
    args = [lens, time, x1, x0]
    if not drop_audio_cond:
        in_specs.append(seq_spec(D_MEL))
        args.append(cond_bf)
    if not drop_text:
        in_specs.append(seq_spec(DIM))
        args.append(text_bf)
    in_specs += [pl.BlockSpec((1, 1, DIM), lambda b, s: (b, 0, 0)),
                 full_spec(win_bf), full_spec(wout_bf)]
    args += [bias, win_bf, wout_bf]

    pred, loss_part = pl.pallas_call(
        kernel,
        grid=(B, S),
        in_specs=in_specs,
        out_specs=[seq_spec(D_MEL),
                   pl.BlockSpec((1, 1, D_MEL), lambda b, s: (b, s, 0))],
        out_shape=[jax.ShapeDtypeStruct((B, N, D_MEL), jnp.float32),
                   jax.ShapeDtypeStruct((B, S, D_MEL), jnp.float32)],
        compiler_params=pltpu.CompilerParams(
            dimension_semantics=("parallel", "parallel"),
            vmem_limit_bytes=48 * 1024 * 1024),
    )(*args)

    # loss[mask].mean() == sum(masked sq err) / (num masked rows * D_MEL)
    denom = jnp.sum(jnp.minimum(lens, N)).astype(jnp.float32) * float(D_MEL)
    loss_mean = jnp.sum(loss_part) / denom

    aux = dict(x1=x1, x0=x0, time=time, lens=lens, bias=bias,
               cond_bf=cond_bf, text_bf=text_bf, win_bf=win_bf, wout_bf=wout_bf,
               drop_audio_cond=drop_audio_cond, drop_text=drop_text)
    return loss_mean, ref_mel, pred, aux


# ---------------------------------------------------------------------------
# Pure-JAX reference (uses exactly the same prepped operands for the check).
# ---------------------------------------------------------------------------
def reference_forward(params, aux):
    x1, x0 = aux["x1"], aux["x0"]
    t = aux["time"][:, None, None]
    phi = (1.0 - t) * x0 + t * x1
    flow = x1 - x0
    xin = phi.astype(jnp.bfloat16)
    if not aux["drop_audio_cond"]:
        xin = jnp.concatenate([xin, aux["cond_bf"]], axis=-1)
    h = jnp.dot(xin, aux["win_bf"], preferred_element_type=jnp.float32)
    h = h + aux["bias"]
    if not aux["drop_text"]:
        h = h + aux["text_bf"].astype(jnp.float32)
    h = jnp.tanh(h)
    pred = jnp.dot(h.astype(jnp.bfloat16), aux["wout_bf"],
                   preferred_element_type=jnp.float32)
    N, D = x1.shape[1], x1.shape[2]
    mask = (jnp.arange(N)[None, :] < aux["lens"][:, None])[..., None]
    sq = jnp.where(mask, (pred - flow) ** 2, 0.0)
    loss = jnp.sum(sq) / (jnp.sum(jnp.minimum(aux["lens"], N)).astype(jnp.float32) * D)
    return loss, pred


# ---------------------------------------------------------------------------
# Main
# ---------------------------------------------------------------------------
if __name__ == "__main__":
    B, N = 2, 16
    D_MEL, D_SPK, DIM = 128, 64, 128        # 128-lane-dense feature dims
    NC, DC, REPEATS, VOCAB = 8, 2, 2, 50    # NC * REPEATS == N

    root = jax.random.PRNGKey(0)
    keys = jax.random.split(root, 12)

    s = 0.05
    params = {
        "wx":   s * jax.random.normal(keys[0], (D_MEL, DIM), jnp.float32),
        "wc":   s * jax.random.normal(keys[1], (D_MEL, DIM), jnp.float32),
        "ws":   s * jax.random.normal(keys[2], (D_SPK, DIM), jnp.float32),
        "wt":   s * jax.random.normal(keys[3], (1, DIM), jnp.float32),
        "bt":   s * jax.random.normal(keys[4], (1, DIM), jnp.float32),
        "wout": s * jax.random.normal(keys[5], (DIM, D_MEL), jnp.float32),
        "codec_emb": s * jax.random.normal(keys[6], (VOCAB, DIM), jnp.float32),
    }

    inp     = jax.random.normal(keys[7], (B, N, D_MEL), jnp.float32)   # x1 mel
    ref_mel = jax.random.normal(keys[8], (B, N, D_MEL), jnp.float32)
    spk     = jax.random.normal(keys[9], (B, D_SPK), jnp.float32)
    codec   = jax.random.randint(keys[10], (B, NC, DC), 0, VOCAB)
    lens    = jnp.array([N, N - 4], dtype=jnp.int32)

    # Default path (drop flags from random.Random(0): both False -> full model).
    loss_mean, _, pred, aux = codec_cfm_forward(
        inp, codec, spk, ref_mel, params, lens=lens, repeats=REPEATS, key=keys[11])
    loss_mean = jax.block_until_ready(loss_mean)
    pred = jax.block_until_ready(pred)

    loss_ref_v, pred_ref_v = reference_forward(params, aux)
    assert jnp.allclose(pred, pred_ref_v, atol=2e-3, rtol=1e-2), "pred mismatch"
    assert jnp.allclose(loss_mean, loss_ref_v, atol=1e-3, rtol=1e-2), "loss mismatch"

    # CFG-null path (drop_audio_cond=True, drop_text=True): cond/text streams are
    # omitted from the kernel argument list entirely.
    loss2, _, pred2, aux2 = codec_cfm_forward(
        inp, codec, spk, ref_mel, params, lens=lens, repeats=REPEATS,
        key=keys[11], force_drop=(True, True))
    loss2 = jax.block_until_ready(loss2)
    pred2 = jax.block_until_ready(pred2)

    loss_ref2, pred_ref2 = reference_forward(params, aux2)
    assert jnp.allclose(pred2, pred_ref2, atol=2e-3, rtol=1e-2), "pred mismatch (drop)"
    assert jnp.allclose(loss2, loss_ref2, atol=1e-3, rtol=1e-2), "loss mismatch (drop)"

    print("KERNEL_OK")
</pallas_src>

<mosaic_0001>
module attributes {stable_mosaic.version = 11 : i64} {
  func.func @kernel(%arg0: i32, %arg1: i32, %arg2: memref<2xi32, #tpu.memory_space<smem>>, %arg3: memref<2xf32, #tpu.memory_space<smem>>, %arg4: memref<1x16x128xf32, #tpu.memory_space<vmem>>, %arg5: memref<1x16x128xf32, #tpu.memory_space<vmem>>, %arg6: memref<1x16x128xbf16, #tpu.memory_space<vmem>>, %arg7: memref<1x16x128xbf16, #tpu.memory_space<vmem>>, %arg8: memref<1x1x128xf32, #tpu.memory_space<vmem>>, %arg9: memref<256x128xbf16, #tpu.memory_space<vmem>>, %arg10: memref<128x128xbf16, #tpu.memory_space<vmem>>, %arg11: memref<1x16x128xf32, #tpu.memory_space<vmem>>, %arg12: memref<1x1x128xf32, #tpu.memory_space<vmem>>) attributes {dimension_semantics = [#tpu.dimension_semantics<parallel>, #tpu.dimension_semantics<parallel>], iteration_bounds = array<i64: 2, 1>, scalar_prefetch = 0 : i64, scratch_operands = 0 : i64, tpu.core_type = #tpu.core_type<tc>, window_params = [{transform_indices = @transform_0, window_bounds = array<i64: 2>}, {transform_indices = @transform_1, window_bounds = array<i64: 2>}, {transform_indices = @transform_2, window_bounds = array<i64: 1, 16, 128>}, {transform_indices = @transform_3, window_bounds = array<i64: 1, 16, 128>}, {transform_indices = @transform_4, window_bounds = array<i64: 1, 16, 128>}, {transform_indices = @transform_5, window_bounds = array<i64: 1, 16, 128>}, {transform_indices = @transform_6, window_bounds = array<i64: 1, 1, 128>}, {pipeline_mode = #tpu.pipeline_mode<synchronous>, transform_indices = @transform_7, window_bounds = array<i64: 256, 128>}, {pipeline_mode = #tpu.pipeline_mode<synchronous>, transform_indices = @transform_8, window_bounds = array<i64: 128, 128>}, {transform_indices = @transform_9, window_bounds = array<i64: 1, 16, 128>}, {transform_indices = @transform_10, window_bounds = array<i64: 1, 1, 128>}]} {
    %0 = arith.index_cast %arg0 : i32 to index
    %1 = memref.load %arg3[%0] : memref<2xf32, #tpu.memory_space<smem>>
    %c0 = arith.constant 0 : index
    %c0_0 = arith.constant 0 : index
    %c0_1 = arith.constant 0 : index
    %2 = vector.load %arg4[%c0, %c0_0, %c0_1] : memref<1x16x128xf32, #tpu.memory_space<vmem>>, vector<1x16x128xf32>
    %3 = vector.shape_cast %2 : vector<1x16x128xf32> to vector<16x128xf32>
    %c0_2 = arith.constant 0 : index
    %c0_3 = arith.constant 0 : index
    %c0_4 = arith.constant 0 : index
    %4 = vector.load %arg5[%c0_2, %c0_3, %c0_4] : memref<1x16x128xf32, #tpu.memory_space<vmem>>, vector<1x16x128xf32>
    %5 = vector.shape_cast %4 : vector<1x16x128xf32> to vector<16x128xf32>
    %cst = arith.constant 1.000000e+00 : f32
    %6 = arith.subf %cst, %1 : f32
    %7 = vector.broadcast %6 : f32 to vector<16x128xf32>
    %8 = arith.mulf %7, %5 : vector<16x128xf32>
    %9 = vector.broadcast %1 : f32 to vector<16x128xf32>
    %10 = arith.mulf %9, %3 : vector<16x128xf32>
    %11 = arith.addf %8, %10 : vector<16x128xf32>
    %12 = arith.subf %3, %5 : vector<16x128xf32>
    %13 = arith.truncf %11 : vector<16x128xf32> to vector<16x128xbf16>
    %c0_5 = arith.constant 0 : index
    %c0_6 = arith.constant 0 : index
    %c0_7 = arith.constant 0 : index
    %14 = vector.load %arg6[%c0_5, %c0_6, %c0_7] : memref<1x16x128xbf16, #tpu.memory_space<vmem>>, vector<1x16x128xbf16>
    %15 = vector.shape_cast %14 : vector<1x16x128xbf16> to vector<16x128xbf16>
    %16 = tpu.concatenate %13, %15 in 1 : vector<16x128xbf16>, vector<16x128xbf16> -> vector<16x256xbf16>
    %c0_8 = arith.constant 0 : index
    %c0_9 = arith.constant 0 : index
    %17 = vector.load %arg9[%c0_8, %c0_9] : memref<256x128xbf16, #tpu.memory_space<vmem>>, vector<256x128xbf16>
    %cst_10 = arith.constant dense<0.000000e+00> : vector<16x128xf32>
    %18 = tpu.matmul %16, %17, %cst_10 {dimension_numbers = #tpu.dot_dimension_numbers<[1], [0], [0], [1], [0, 0, 1, 1], [], []>} : vector<16x256xbf16>, vector<256x128xbf16>, vector<16x128xf32> -> vector<16x128xf32>
    %c0_11 = arith.constant 0 : index
    %c0_12 = arith.constant 0 : index
    %c0_13 = arith.constant 0 : index
    %19 = vector.load %arg8[%c0_11, %c0_12, %c0_13] : memref<1x1x128xf32, #tpu.memory_space<vmem>>, vector<1x1x128xf32>
    %20 = vector.shape_cast %19 : vector<1x1x128xf32> to vector<1x128xf32>
    %21 = vector.broadcast %20 : vector<1x128xf32> to vector<16x128xf32>
    %22 = arith.addf %18, %21 : vector<16x128xf32>
    %c0_14 = arith.constant 0 : index
    %c0_15 = arith.constant 0 : index
    %c0_16 = arith.constant 0 : index
    %23 = vector.load %arg7[%c0_14, %c0_15, %c0_16] : memref<1x16x128xbf16, #tpu.memory_space<vmem>>, vector<1x16x128xbf16>
    %24 = vector.shape_cast %23 : vector<1x16x128xbf16> to vector<16x128xbf16>
    %25 = arith.extf %24 : vector<16x128xbf16> to vector<16x128xf32>
    %26 = arith.addf %22, %25 : vector<16x128xf32>
    %27 = math.tanh %26 : vector<16x128xf32>
    %28 = arith.truncf %27 : vector<16x128xf32> to vector<16x128xbf16>
    %c0_17 = arith.constant 0 : index
    %c0_18 = arith.constant 0 : index
    %29 = vector.load %arg10[%c0_17, %c0_18] : memref<128x128xbf16, #tpu.memory_space<vmem>>, vector<128x128xbf16>
    %cst_19 = arith.constant dense<0.000000e+00> : vector<16x128xf32>
    %30 = tpu.matmul %28, %29, %cst_19 {dimension_numbers = #tpu.dot_dimension_numbers<[1], [0], [0], [1], [0, 0, 1, 1], [], []>} : vector<16x128xbf16>, vector<128x128xbf16>, vector<16x128xf32> -> vector<16x128xf32>
    %c0_20 = arith.constant 0 : index
    %c0_21 = arith.constant 0 : index
    %c0_22 = arith.constant 0 : index
    %31 = vector.load %arg11[%c0_20, %c0_21, %c0_22] : memref<1x16x128xf32, #tpu.memory_space<vmem>>, vector<1x16x128xf32>
    %32 = vector.shape_cast %31 : vector<1x16x128xf32> to vector<16x128xf32>
    %33 = vector.shape_cast %30 : vector<16x128xf32> to vector<1x16x128xf32>
    tpu.vector_store %arg11[%c0_20, %c0_21, %c0_22], %33 {strides = array<i32>} : memref<1x16x128xf32, #tpu.memory_space<vmem>>, vector<1x16x128xf32>,
    %34 = tpu.iota {dimensions = array<i32: 0>} : vector<16x1xi32>
    %c16_i32 = arith.constant 16 : i32
    %35 = arith.muli %arg1, %c16_i32 : i32
    %36 = vector.broadcast %35 : i32 to vector<16x1xi32>
    %37 = arith.addi %34, %36 : vector<16x1xi32>
    %38 = arith.index_cast %arg0 : i32 to index
    %39 = memref.load %arg2[%38] : memref<2xi32, #tpu.memory_space<smem>>
    %40 = vector.broadcast %39 : i32 to vector<16x1xi32>
    %41 = arith.cmpi slt, %37, %40 : vector<16x1xi32>
    %42 = arith.subf %30, %12 : vector<16x128xf32>
    %43 = arith.mulf %42, %42 : vector<16x128xf32>
    %cst_23 = arith.constant 0.000000e+00 : f32
    %44 = vector.shape_cast %41 : vector<16x1xi1> to vector<16x1xi1>
    %45 = vector.broadcast %44 : vector<16x1xi1> to vector<16x128xi1>
    %46 = vector.broadcast %cst_23 : f32 to vector<16x128xf32>
    %47 = arith.select %45, %43, %46 : vector<16x128xi1>, vector<16x128xf32>
    %cst_24 = arith.constant dense<0.000000e+00> : vector<128xf32>
    %48 = vector.multi_reduction <add>, %47, %cst_24 [0] : vector<16x128xf32> to vector<128xf32>
    %49 = vector.shape_cast %48 : vector<128xf32> to vector<1x128xf32>
    %c0_25 = arith.constant 0 : index
    %c0_26 = arith.constant 0 : index
    %c0_27 = arith.constant 0 : index
    %50 = vector.load %arg12[%c0_25, %c0_26, %c0_27] : memref<1x1x128xf32, #tpu.memory_space<vmem>>, vector<1x1x128xf32>
    %51 = vector.shape_cast %50 : vector<1x1x128xf32> to vector<1x128xf32>
    %52 = vector.shape_cast %49 : vector<1x128xf32> to vector<1x1x128xf32>
    tpu.vector_store %arg12[%c0_25, %c0_26, %c0_27], %52 {strides = array<i32>} : memref<1x1x128xf32, #tpu.memory_space<vmem>>, vector<1x1x128xf32>,
    return
  }
  func.func @transform_0(%arg0: i32, %arg1: i32) -> i32 {
    %c0_i32 = arith.constant 0 : i32
    %c0_i32_0 = arith.constant 0 : i32
    return %c0_i32 : i32
  }
  func.func @transform_1(%arg0: i32, %arg1: i32) -> i32 {
    %c0_i32 = arith.constant 0 : i32
    %c0_i32_0 = arith.constant 0 : i32
    return %c0_i32 : i32
  }
  func.func @transform_2(%arg0: i32, %arg1: i32) -> (i32, i32, i32) {
    %c0_i32 = arith.constant 0 : i32
    %c0_i32_0 = arith.constant 0 : i32
    return %arg0, %arg1, %c0_i32 : i32, i32, i32
  }
  func.func @transform_3(%arg0: i32, %arg1: i32) -> (i32, i32, i32) {
    %c0_i32 = arith.constant 0 : i32
    %c0_i32_0 = arith.constant 0 : i32
    return %arg0, %arg1, %c0_i32 : i32, i32, i32
  }
  func.func @transform_4(%arg0: i32, %arg1: i32) -> (i32, i32, i32) {
    %c0_i32 = arith.constant 0 : i32
    %c0_i32_0 = arith.constant 0 : i32
    return %arg0, %arg1, %c0_i32 : i32, i32, i32
  }
  func.func @transform_5(%arg0: i32, %arg1: i32) -> (i32, i32, i32) {
    %c0_i32 = arith.constant 0 : i32
    %c0_i32_0 = arith.constant 0 : i32
    return %arg0, %arg1, %c0_i32 : i32, i32, i32
  }
  func.func @transform_6(%arg0: i32, %arg1: i32) -> (i32, i32, i32) {
    %c0_i32 = arith.constant 0 : i32
    %c0_i32_0 = arith.constant 0 : i32
    %c0_i32_1 = arith.constant 0 : i32
    return %arg0, %c0_i32, %c0_i32_0 : i32, i32, i32
  }
  func.func @transform_7(%arg0: i32, %arg1: i32) -> (i32, i32) {
    %c0_i32 = arith.constant 0 : i32
    %c0_i32_0 = arith.constant 0 : i32
    %c0_i32_1 = arith.constant 0 : i32
    return %c0_i32, %c0_i32_0 : i32, i32
  }
  func.func @transform_8(%arg0: i32, %arg1: i32) -> (i32, i32) {
    %c0_i32 = arith.constant 0 : i32
    %c0_i32_0 = arith.constant 0 : i32
    %c0_i32_1 = arith.constant 0 : i32
    return %c0_i32, %c0_i32_0 : i32, i32
  }
  func.func @transform_9(%arg0: i32, %arg1: i32) -> (i32, i32, i32) {
    %c0_i32 = arith.constant 0 : i32
    %c0_i32_0 = arith.constant 0 : i32
    return %arg0, %arg1, %c0_i32 : i32, i32, i32
  }
  func.func @transform_10(%arg0: i32, %arg1: i32) -> (i32, i32, i32) {
    %c0_i32 = arith.constant 0 : i32
    %c0_i32_0 = arith.constant 0 : i32
    return %arg0, %arg1, %c0_i32 : i32, i32, i32
  }
}

</mosaic_0001>

<bundles_post_ra>
// kernel: tpu_custom_call.1
= control target key start
LH: loop header
LB: loop body
LE: loop exit
PB: predicated region body
PF: predicated region fallthrough
CT: control target
= control target key end

     0   :  { %s2285_s0 = inlined_call_operand.hbm [shape: s32[2], index: 0, kind: input, shape index: {}]   ;;  %s2286_s1 = inlined_call_operand.vmem [shape: f32[2], index: 1, kind: input, shape index: {}]   ;;  %s2287_s2 = inlined_call_operand.hbm [shape: f32[2,16,128], index: 2, kind: input, shape index: {}]   ;;  %s2288_s3 = inlined_call_operand.hbm [shape: f32[2,16,128], index: 3, kind: input, shape index: {}]   ;;  %s2289_s4 = inlined_call_operand.hbm [shape: bf16[2,16,128], index: 4, kind: input, shape index: {}]   ;;  %s2290_s5 = inlined_call_operand.hbm [shape: bf16[2,16,128], index: 5, kind: input, shape index: {}]   ;;  %s2291_s6 = inlined_call_operand.vmem [shape: f32[2,1,128], index: 6, kind: input, shape index: {}]   ;;  %s2292_s7 = inlined_call_operand.hbm [shape: bf16[256,128], index: 7, kind: input, shape index: {}]   ;;  %s2293_s8 = inlined_call_operand.hbm [shape: bf16[128,128], index: 8, kind: input, shape index: {}]   ;;  %s2294_s9 = inlined_call_operand.hbm [shape: f32[2,16,128], index: 9, kind: output, shape index: {0}]   ;;  %s2295_s10 = inlined_call_operand.hbm [shape: f32[2,1,128], index: 10, kind: output, shape index: {1}]  }
   0x1   :  { %2319 = sst [smem:[#allocation35_spill]] %s2285_s0 }
   0x2   :  { %2320 = sst [smem:[#allocation36_spill]] %s2286_s1 }
   0x3   :  { %2321 = sst [smem:[#allocation37_spill]] %s2287_s2 }
   0x4   :  { %2322 = sst [smem:[#allocation38_spill]] %s2288_s3 }
   0x5   :  { %2323 = sst [smem:[#allocation39_spill]] %s2292_s7 }
   0x6   :  { %2324 = sst [smem:[#allocation40_spill]] %s2293_s8 }
   0x7   :  { %2325 = sst [smem:[#allocation41_spill]] %s2294_s9 }
   0x8   :  { %2326 = sst [smem:[#allocation42_spill]] %s2295_s10 }
   0x9   :  { %16 = vsyncpa [#allocation5], 0 }
   0xa   :  { %17 = vsyncpa [#allocation6], 0 }
   0xb   :  { %18 = vsyncpa [#allocation3], 0 }
   0xc   :  { %20 = vsyncpa [#allocation3 + $0x1], 0 }
   0xd   :  { %21 = vsyncpa [#allocation10], 0 }
   0xe   :  { %23 = vsyncpa [#allocation10 + $0x1], 0 }
   0xf   :  { %24 = vsyncpa [#allocation13], 0 }
  0x10   :  { %26 = vsyncpa [#allocation13 + $0x1], 0 }
  0x11   :  { %27 = vsyncpa [#allocation16], 0 }
  0x12   :  { %28 = vsyncpa [#allocation4], 0 }
  0x13   :  { %30 = vsyncpa [#allocation4 + $0x1], 0 }
  0x14   :  { %31 = vsyncpa [#allocation19], 0 }
  0x15   :  { %33 = vsyncpa [#allocation19 + $0x1], 0  ;;  %s1915_s13 = smov 0   ;;  %s1917_s14 = smov 0  }
  0x16   :  { %s1919_s15 = smov 0   ;;  %s1921_s16 = smov 0  }
  0x17   :  { %s1923_s17 = smov 0   ;;  %s1925_s18 = smov 0  }
  0x18 LB: > { %2327 = sst [smem:[#allocation29_spill]] %s1820_s13  ;;  %s1946_s19 = sadd.s32 4294967295, %s1840_s18   ;;  %s1840_s18 = sphi %s1925_s18, %s39_s18   ;;  %s1836_s17 = sphi %s1923_s17, %s2386_s17   ;;  %s1832_s16 = sphi %s1921_s16, %s2385_s16   ;;  %s1828_s15 = sphi %s1919_s15, %s2381_s15   ;;  %s1824_s14 = sphi %s1917_s14, %s2384_s14   ;;  %s1820_s13 = sphi %s1915_s13, %s2383_s13  }
  0x19   : > { %2328 = sst [smem:[#allocation30_spill]] %s1828_s15  ;;  %s1235_s20 = sadd.s32 4294967294, %s1840_s18  }
  0x1a   : > { %p115_p0 = scmp.ne.s32.totalorder %s1824_s14, %s1820_s13  ;;  %p2306_p1 = scmp.eq.s32.totalorder %s1946_s19, 0 }
  0x1b   : > { %p299_p3 = scmp.eq.s32.totalorder %s1235_s20, 1  ;;  %p1236_p5 = scmp.ge.s32.totalorder %s1840_s18, 1 }
  0x1c   : > { %p1955_p4 = por %p2306_p1, %p115_p0  ;;  %p334_p7 = scmp.lt.s32.totalorder %s1840_s18, 3 }
  0x1d   : > { %p1960_p6 = por %p299_p3, %p115_p0  ;;  %s1842_s24 = smov [#allocation14]  }
  0x1e   : > { %s2329_s21 = scalar_select %p1955_p4, 1, 0 }
  0x1f   : > { %s2330_s22 = scalar_select %p1960_p6, 1, 0 }
  0x20   : > { %p1965_p8 = pnand %p1236_p5, %p334_p7  ;;  %s366_s25 = sshll.u32 %s1842_s24, 4  ;;  %s367_s25 = int_to_ptr.vmem [resolvable:$true] %s366_s25 }
  0x21   : > { %2331 = sst [smem:[#allocation31_spill]] %s2330_s22  ;;  %s51_s27 = sadd.s32 1, %s1836_s17 }
  0x22   : > { %s2332_s23 = scalar_select %p1965_p8, 1, 0 }
  0x23   : > { %p1384_p9 = pneg %p1965_p8  ;;  %s1527_s28 = scalar_lea.vmem %s367_s25, 2048 }
  0x24   : > { %p1528_p13 = scmp.ne.s32.totalorder %s367_s25, %s1527_s28  ;;  %p1535_p5 = scmp.lt.s32.totalorder %s367_s25, %s367_s25 }
  0x25   : > { %p1974_p11 = pnand %p1384_p9, %p2306_p1  ;;  %p1536_p7 = scmp.lt.s32.totalorder %s1527_s28, %s1527_s28 }
  0x27   : > { %p2307_p12 = pneg %p1974_p11  ;;  %p1537_p2 = por %p1536_p7, %p1535_p5 }
  0x29   : > { %p1530_p0 = pnand %p1528_p13, %p2307_p12 }
  0x2b   : > { %p1531_p3 = pneg %p1530_p0 }
  0x2d   : > { %p1538_p10 = pnand %p1537_p2, %p1531_p3 }
  0x2f   : > { %1541 = shalt.err (!%p1538_p10)
}
  0x30   : > { %s2296_s29 = smov 64   ;;  %s2298_s30 = smov 4  }
  0x31   : > { %s2334_s7 = sld [smem:[#allocation39_spill]]  ;;  %p53_p2 = scmp.ge.s32.totalorder %s51_s27, 2 }
  0x32   : > { %s102_s20 = sadd.s32 1, %s1828_s15  ;;  %p109_p9 = scmp.ne.s32.totalorder %s1828_s15, %s1824_s14 }
  0x33   : > { %p110_p10 = scmp.eq.s32.totalorder %s1840_s18, 0  ;;  %s2388_s27 = smov (%p53_p2, %s51_s27), 0 }
  0x34   : > { %2335 = sst [smem:[#allocation32_spill]] %s2388_s27  ;;  %p2336_p0 = scmp.eq.s32.totalorder %s1946_s19, 1 }
  0x35   : > { %p111_p13 = por %p110_p10, %p109_p9  ;;  %s97_s28 = ssub.s32 %s1836_s17, %s2388_s27 }
  0x36   : > { %p2000_p3 = por %p2336_p0, %p109_p9  ;;  %p1421_p5 = scmp.lt.s32.totalorder %s1840_s18, 2 }
  0x37   : > { %1393 = dma.hbm_to_vmem [thread:$0]  (!%p1974_p11), %s2334_s7, 2048, %s367_s25, [#allocation13], %s2296_s29, %s2296_s29, %s2298_s30  }
  0x38   : > { %s2337_s24 = scalar_select %p2000_p3, 1, 0 }
  0x39   : > { %p100_p7 = scmp.eq.s32.totalorder %s97_s28, 0  ;;  %s2008_s25 = sand.u32 1, %s1828_s15  }
  0x3a   : > { %2338 = sst [smem:[#allocation33_spill]] %s2337_s24  ;;  %s2309_s11 = sshll.u32 %s2008_s25, 4 }
  0x3b   : > { %s2310_s12 = sshll.u32 %s1836_s17, 8  ;;  %p2015_p2 = pnand %p1421_p5, %p111_p13 }
  0x3c   : > { %s2013_s29 = scalar_select %p100_p7, %s1828_s15, %s102_s20  }
  0x3d   : > { %s2308_s7 = sand.u32 1, %s1840_s18   ;;  %s2341_s3 = sld [smem:[#allocation38_spill]] }
  0x3e   : > { %2339 = sst [smem:[#allocation34_spill]] %s2013_s29  ;;  %s420_s13 = scalar_lea.vmem [#allocation9], %s2309_s11 }
  0x3f   : > { %s429_s10 = sshll.u32 %s420_s13, 4  ;;  %s2029_s9 = scalar_lea.sflag [#allocation10], %s2308_s7  ;;  %s430_s10 = int_to_ptr.vmem [resolvable:$true] %s429_s10 }
  0x40   : > { %p2311_p9 = pneg %p2015_p2  ;;  %s1555_s20 = scalar_lea.vmem %s430_s10, 256 }
  0x41   : > { %p1556_p10 = scmp.ne.s32.totalorder %s430_s10, %s1555_s20  ;;  %s1845_s29 = smov [#allocation9]  }
  0x42   : > { %s1560_s15 = sshll.u32 %s1845_s29, 4  ;;  %s1561_s15 = int_to_ptr.vmem [resolvable:$false] %s1560_s15 }
  0x43   : > { %s428_s28 = scalar_lea.hbm %s2341_s3, %s2310_s12  ;;  %p1558_p13 = pnand %p1556_p10, %p2311_p9 }
  0x44   : > { %s1562_s22 = scalar_lea.vmem %s1561_s15, 512  ;;  %p1563_p5 = scmp.lt.s32.totalorder %s430_s10, %s1561_s15 }
  0x45   : > { %p1559_p0 = pneg %p1558_p13  ;;  %p1564_p7 = scmp.lt.s32.totalorder %s1562_s22, %s1555_s20 }
  0x47   : > { %p1565_p1 = por %p1564_p7, %p1563_p5 }
  0x49   : > { %p1566_p12 = pnand %p1565_p1, %p1559_p0 }
  0x4b   : > { %1569 = shalt.err (!%p1566_p12)
}
  0x4c   : > { %s2315_s13 = smov 128   ;;  %s2316_s27 = smov 8  }
  0x4d   : > { %1403 = dma.hbm_to_vmem [thread:$0]  (!%p2015_p2), %s428_s28, 256, %s430_s10, %s2029_s9, %s2315_s13, %s2315_s13, %s2316_s27  }
  0x4e   : > { %s1848_s7 = smov [#allocation2]   ;;  %s2342_s0 = sld [smem:[#allocation35_spill]] }
  0x4f   : > { %s2343_s1 = sld [smem:[#allocation36_spill]]  ;;  %p2344_p12 = pneg %p1974_p11 }
  0x54   : > { %1387 = dma.hbm_to_smem (!%p1974_p11), %s2342_s0, 16, %s1848_s7, [#allocation5]  }
  0x55   : > { %s356_s22 = sshll.u32 %s2343_s1, 4  ;;  %s357_s22 = int_to_ptr.vmem [resolvable:$true] %s356_s22 }
  0x56   : > { %s1581_s12 = scalar_lea.vmem %s357_s22, 16  ;;  %p1589_p0 = scmp.lt.s32.totalorder %s357_s22, %s357_s22 }
  0x57   : > { %p1582_p1 = scmp.ne.s32.totalorder %s357_s22, %s1581_s12  ;;  %p1590_p5 = scmp.lt.s32.totalorder %s1581_s12, %s1581_s12 }
  0x59   : > { %p1584_p10 = pnand %p1582_p1, %p2344_p12  ;;  %p1591_p7 = por %p1590_p5, %p1589_p0 }
  0x5b   : > { %p1585_p13 = pneg %p1584_p10 }
  0x5d   : > { %p1592_p9 = pnand %p1591_p7, %p1585_p13 }
  0x5f   : > { %1595 = shalt.err (!%p1592_p9)
}
  0x60   : > { %s1849_s10 = smov [#allocation7]   ;;  %s1850_s7 = smov [#allocation15]  }
  0x61   : > { %1390 = dma.vmem_to_smem (!%p1974_p11), %s357_s22, 16, %s1849_s10, [#allocation6]  }
  0x62   : > { %s379_s11 = sshll.u32 %s1850_s7, 4  ;;  %p2345_p3 = pmov %p2344_p12  ;;  %s380_s11 = int_to_ptr.vmem [resolvable:$true] %s379_s11 }
  0x63   : > { %s1607_s28 = scalar_lea.vmem %s380_s11, 1024  ;;  %p1615_p12 = scmp.lt.s32.totalorder %s380_s11, %s380_s11 }
  0x64   : > { %p1608_p6 = scmp.ne.s32.totalorder %s380_s11, %s1607_s28  ;;  %p1616_p10 = scmp.lt.s32.totalorder %s1607_s28, %s1607_s28 }
  0x66   : > { %p1610_p4 = pnand %p1608_p6, %p2345_p3  ;;  %p1617_p8 = por %p1616_p10, %p1615_p12 }
  0x68   : > { %p1611_p1 = pneg %p1610_p4 }
  0x6a   : > { %p1618_p0 = pnand %p1617_p8, %p1611_p1 }
  0x6c   : > { %1621 = shalt.err (!%p1618_p0)
}
  0x6d   : > { %s2346_s12 = smov 4   ;;  %s2347_s29 = smov 64  }
  0x6e   : > { %s2348_s8 = sld [smem:[#allocation40_spill]]  ;;  %s2349_s22 = sshll.u32 %s1836_s17, 8 }
  0x6f   : > { %s2350_s2 = sld [smem:[#allocation37_spill]]  ;;  %s2351_s13 = sshll.u32 %s2008_s25, 4 }
  0x70   : > { %s397_s27 = scalar_lea.vmem [#allocation8], %s2351_s13  ;;  %s1248_s0 = sshll.u32 %s2008_s25, 3 }
  0x71   : > { %s406_s26 = sshll.u32 %s397_s27, 4  ;;  %s394_s1 = scalar_lea.sflag [#allocation3], %s2008_s25  ;;  %s407_s26 = int_to_ptr.vmem [resolvable:$true] %s406_s26 }
  0x72   : > { %s1635_s3 = scalar_lea.vmem %s407_s26, 256  ;;  %p2352_p6 = pneg %p2015_p2 }
  0x73   : > { %p1636_p4 = scmp.ne.s32.totalorder %s407_s26, %s1635_s3  ;;  %s1851_s15 = smov [#allocation8]  }
  0x74   : > { %1396 = dma.hbm_to_vmem [thread:$0]  (!%p1974_p11), %s2348_s8, 1024, %s380_s11, [#allocation16], %s2347_s29, %s2347_s29, %s2346_s12  }
  0x75   : > { %s405_s28 = scalar_lea.hbm %s2350_s2, %s2349_s22  ;;  %p1638_p8 = pnand %p1636_p4, %p2352_p6 }
  0x76   : > { %s1640_s20 = sshll.u32 %s1851_s15, 4  ;;  %s1641_s20 = int_to_ptr.vmem [resolvable:$false] %s1640_s20 }
  0x77   : > { %p1639_p3 = pneg %p1638_p8  ;;  %s1642_s11 = scalar_lea.vmem %s1641_s20, 512 }
  0x78   : > { %p1643_p11 = scmp.lt.s32.totalorder %s407_s26, %s1641_s20  ;;  %p1644_p9 = scmp.lt.s32.totalorder %s1642_s11, %s1635_s3 }
  0x7a   : > { %p1645_p13 = por %p1644_p9, %p1643_p11 }
  0x7c   : > { %p1646_p5 = pnand %p1645_p13, %p1639_p3 }
  0x7e   : > { %1649 = shalt.err (!%p1646_p5)
}
  0x7f   : > { %s2353_s13 = smov 8   ;;  %s2354_s27 = smov 128  }
  0x80   : > { %1400 = dma.hbm_to_vmem [thread:$0]  (!%p2015_p2), %s405_s28, 256, %s407_s26, %s394_s1, %s2354_s27, %s2354_s27, %s2353_s13  }
  0x81   : > { %s1298_s22 = sshll.u32 %s1836_s17, 7  ;;  %s443_s20 = scalar_lea.vmem [#allocation11], %s1248_s0 }
  0x82   : > { %s451_s15 = scalar_lea.hbm %s2289_s4, %s1298_s22  ;;  %s452_s3 = sshll.u32 %s443_s20, 4  ;;  %s453_s3 = int_to_ptr.vmem [resolvable:$true] %s452_s3 }
  0x83   : > { %s1663_s11 = scalar_lea.vmem %s453_s3, 128  ;;  %p2355_p1 = pmov %p2352_p6 }
  0x84   : > { %p1664_p7 = scmp.ne.s32.totalorder %s453_s3, %s1663_s11  ;;  %s1852_s2 = smov [#allocation11]  }
  0x85   : > { %s1668_s8 = sshll.u32 %s1852_s2, 4  ;;  %s1669_s8 = int_to_ptr.vmem [resolvable:$false] %s1668_s8 }
  0x86   : > { %p1666_p12 = pnand %p1664_p7, %p2355_p1  ;;  %s1670_s24 = scalar_lea.vmem %s1669_s8, 256 }
  0x87   : > { %p1671_p0 = scmp.lt.s32.totalorder %s453_s3, %s1669_s8  ;;  %p1672_p4 = scmp.lt.s32.totalorder %s1670_s24, %s1663_s11 }
  0x88   : > { %p1667_p10 = pneg %p1666_p12 }
  0x89   : > { %p1673_p6 = por %p1672_p4, %p1671_p0 }
  0x8b   : > { %p1674_p8 = pnand %p1673_p6, %p1667_p10 }
  0x8d   : > { %1677 = shalt.err (!%p1674_p8)
}
  0x8e   : > { %1406 = dma.hbm_to_vmem [thread:$0]  (!%p2015_p2), %s451_s15, 128, %s453_s3, %s2029_s9, %s2347_s29, %s2347_s29, %s2346_s12  }
  0x8f   : > { %s474_s2 = scalar_lea.hbm %s2290_s5, %s1298_s22  ;;  %s466_s8 = scalar_lea.vmem [#allocation12], %s1248_s0 }
  0x90   : > { %s475_s24 = sshll.u32 %s466_s8, 4  ;;  %s2356_s26 = sand.u32 1, %s1840_s18   ;;  %s476_s24 = int_to_ptr.vmem [resolvable:$true] %s475_s24 }
  0x91   : > { %s463_s13 = scalar_lea.sflag [#allocation13], %s2356_s26  ;;  %s1691_s27 = scalar_lea.vmem %s476_s24, 128 }
  0x92   : > { %p1692_p3 = scmp.ne.s32.totalorder %s476_s24, %s1691_s27  ;;  %p2357_p11 = pmov %p2355_p1 }
  0x93   : > { %s1853_s10 = smov [#allocation12]  }
  0x94   : > { %p1694_p9 = pnand %p1692_p3, %p2357_p11  ;;  %s1696_s7 = sshll.u32 %s1853_s10, 4  ;;  %s1697_s7 = int_to_ptr.vmem [resolvable:$false] %s1696_s7 }
  0x95   : > { %s1698_s9 = scalar_lea.vmem %s1697_s7, 256  ;;  %p1699_p5 = scmp.lt.s32.totalorder %s476_s24, %s1697_s7 }
  0x96   : > { %p1695_p13 = pneg %p1694_p9  ;;  %p1700_p7 = scmp.lt.s32.totalorder %s1698_s9, %s1691_s27 }
  0x98   : > { %p1701_p1 = por %p1700_p7, %p1699_p5 }
  0x9a   : > { %p1702_p12 = pnand %p1701_p1, %p1695_p13 }
  0x9c   : > { %1705 = shalt.err (!%p1702_p12)
}
  0x9d   : > { %1409 = dma.hbm_to_vmem [thread:$0]  (!%p2015_p2), %s474_s2, 128, %s476_s24, %s463_s13, %s2347_s29, %s2347_s29, %s2346_s12  }
  0x9e   : > { %p2358_p10 = scmp.ne.s32.totalorder %s2332_s23, 0 }
  0x9f   : > { %p2359_p0 = scmp.eq.s32.totalorder (!%p2358_p10), %s1946_s19, 0 }
  0xa0   : > { %493 = sbr.rel (%p2358_p10) target bundleno = 681 (0x2a9), region = 56 }
  0xa5   : > { %1783 = dma.done.wait (%p2359_p0), [#allocation5], 16   ;;  %p2360_p4 = pmov %p2359_p0 }
  0xa6   : > { %p2361_p6 = pmov %p2359_p0 }
  0xa7   : > { %1785 = vsyncadd (%p2360_p4), [#allocation5], 4294967280 }
  0xa8   : > { %1787 = dma.done.wait (%p2361_p6), [#allocation6], 16   ;;  %p2362_p8 = pmov %p2359_p0 }
  0xa9   : > { %s2124_s0 = sand.u32 1, %s1824_s14   ;;  %p2363_p2 = scmp.ne.s32.totalorder %s2329_s21, 0 }
  0xaa   : > { %1789 = vsyncadd (%p2362_p8), [#allocation6], 4294967280  ;;  %s2127_s23 = sshll.u32 %s2124_s0, 4  ;;  %s504_s30 = scalar_lea.sflag [#allocation3], %s2124_s0 }
  0xab   : > { %s507_s25 = scalar_lea.vmem [#allocation8], %s2127_s23 }
  0xac   : > { %1791 = dma.done.wait (%p2363_p2), %s504_s30, 256  }
  0xad   : > { %1793 = vsyncadd (%p2363_p2), %s504_s30, 4294967040  ;;  %s512_s12 = sand.u32 1, %s1946_s19   ;;  %s516_s22 = scalar_lea.vmem [#allocation9], %s2127_s23 }
  0xae   : > { %s513_s29 = scalar_lea.sflag [#allocation10], %s512_s12 }
  0xaf   : > { %1795 = dma.done.wait (%p2363_p2), %s513_s29, 384  }
  0xb0   : > { %1797 = vsyncadd (%p2363_p2), %s513_s29, 4294966912  ;;  %s1259_s15 = sshll.u32 %s2124_s0, 3  ;;  %s531_s3 = scalar_lea.sflag [#allocation13], %s512_s12 }
  0xb1   : > { %s2142_s20 = scalar_lea.vmem [#allocation11], %s1259_s15  ;;  %s2144_s11 = scalar_lea.vmem [#allocation12], %s1259_s15 }
  0xb2   : > { %1799 = dma.done.wait (%p2363_p2), %s531_s3, 128  }
  0xb3   : > { %1801 = vsyncadd (%p2363_p2), %s531_s3, 4294967168  ;;  %p2364_p3 = pmov %p2359_p0 }
  0xb4   : > { %p2365_p11 = pmov %p2359_p0 }
  0xb5   : > { %1803 = dma.done.wait (%p2364_p3), [#allocation13], 2048  }
  0xb6   : > { %1805 = vsyncadd (%p2365_p11), [#allocation13], 4294965248  ;;  %p2366_p9 = pmov %p2359_p0 }
  0xb7   : > { %p2367_p13 = pmov %p2359_p0 }
  0xb8   : > { %1807 = dma.done.wait (%p2366_p9), [#allocation16], 1024  }
  0xb9   : > { %1809 = vsyncadd (%p2367_p13), [#allocation16], 4294966272 }
  0xba   : > { %547 = sfence }
  0xbb   : > { %v1487_v0 = vld [vmem:[#allocation14 + $0x78] sm:$0xff]   ;;  %v1489_v2 = vld [vmem:[#allocation14 + $0x70] sm:$0xff]   ;;  %v1854_v3 = vmov 0.0   ;;  %v1491_v5 = vld [vmem:[#allocation14 + $0x68] sm:$0xff]   ;;  %s611_s19 = sld [smem:[#allocation7 + %s1832_s16]]  ;;  %vm1855_vm0 = vmmov 0   ;;  %v928_v56 = vlaneseq }
  0xbc   : > { %v1488_v1 = vld [vmem:[#allocation14 + $0x38] sm:$0xff]   ;;  %1305 = vmatprep.subr.bf16.mxu0 %v1487_v0  ;;  %1336 = vmatprep.subr.bf16.mxu1 %v1854_v3  ;;  %v1490_v4 = vld [vmem:[#allocation14 + $0x30] sm:$0xff]   ;;  %v1492_v6 = vld [vmem:[#allocation14 + $0x28] sm:$0xff]   ;;  %p606_p5 = scmp.lt.s32.totalorder %s1832_s16, 1  ;;  %s935_s24 = sld [smem:[#allocation2 + %s1832_s16]] }
  0xbd   : > { %1306 = vmatpush3.bf16.msra.mxu0 %v1488_v1  ;;  %v1493_v7 = vld [vmem:[#allocation14 + $0x60] sm:$0xff]   ;;  %v1495_v9 = vld [vmem:[#allocation14 + $0x58] sm:$0xff]   ;;  %v1497_v11 = vld [vmem:[#allocation14 + $0x50] sm:$0xff]   ;;  %1352 = vmatprep.mubr.msk.bf16.mxu1 %vm1855_vm0, %v1854_v3  ;;  %s595_s26 = scalar_lea.vmem [#allocation17], %s2127_s23  ;;  %s1300_s27 = sshll.u32 %s1832_s16, 8  ;;  %v929_v59 = vshrl.u32 %v928_v56, 7 }
  0xbe   : > { %1307 = vmatprep.subr.bf16.mxu0 %v1489_v2  ;;  %v1494_v8 = vld [vmem:[#allocation14 + $0x20] sm:$0xff]   ;;  %v1496_v10 = vld [vmem:[#allocation14 + $0x18] sm:$0xff]   ;;  %v1498_v13 = vld [vmem:[#allocation14 + $0x10] sm:$0xff]   ;;  %s607_s1 = scalar_select %p606_p5, %s1832_s16, 1 }
  0xbf   : > { %v1503_v12 = vld [vmem:[%s2142_s20] sm:$0xff]   ;;  %v2167_v15 = vld [vmem:[%s507_s25 + $0x8] sm:$0xff]  ;;  %v1505_v32 = vld [vmem:[#allocation15 + $0x30] sm:$0xff]   ;;  %s977_s13 = sshll.u32 %s595_s26, 4  ;;  %s2368_s10 = sld [smem:[#allocation33_spill]]  ;;  %v930_v63 = vadd.s32 8, %v929_v59  ;;  %s2200_s13 = int_to_ptr.vmem [resolvable:$true] %s977_s13 }
  0xc0   : > { %v2163_v14 = vld [vmem:[%s507_s25] sm:$0xff]  ;;  %v1499_v17 = vld [vmem:[#allocation14 + $0x48] sm:$0xff]   ;;  %803 = vmatprep.mubr.bf16.mxu0 %v1503_v12  ;;  %v1504_v21 = vld [vmem:[#allocation15 + $0x38] sm:$0xff]   ;;  %s608_s8 = scalar_lea.vmem %s2291_s6, %s607_s1  ;;  %s2369_s23 = sld [smem:[#allocation41_spill]] }
  0xc1   : > { %1308 = vmatpush3.bf16.msra.mxu0 %v1490_v4  ;;  %s616_s21 = ssub.f32 1.0, %s611_s19  ;;  %v2171_v16 = vld [vmem:[%s516_s22] sm:$0xff]  ;;  %v2175_v18 = vld [vmem:[%s516_s22 + $0x8] sm:$0xff]  ;;  %v620_v20 = vstv %s611_s19  ;;  %1337 = vmatpush3.bf16.msra.mxu1 %v1504_v21  ;;  %s958_s25 = scalar_lea.sflag [#allocation4], %s2124_s0 }
  0xc2   : > { %1309 = vmatprep.subr.bf16.mxu0 %v1491_v5  ;;  %v1500_v22 = vld [vmem:[#allocation14 + $0x8] sm:$0xff]   ;;  %v621_v25 = vmul.f32 %v620_v20, %v2163_v14  ;;  %v622_v26 = vmul.f32 %v620_v20, %v2167_v15  ;;  %1338 = vmatprep.subr.bf16.mxu1 %v1854_v3  ;;  %v1501_v27 = vld [vmem:[#allocation14 + $0x40] sm:$0xff]   ;;  %v1508_v35 = vld [vmem:[#allocation15 + $0x18] sm:$0xff]   ;;  %v625_v57 = vsub.f32 %v2163_v14, %v2171_v16  ;;  %v936_v0 = vstv %s935_s24  ;;  %s1706_s12 = scalar_lea.vmem %s2200_s13, 256  ;;  %s1856_s29 = smov [#allocation17]  }
  0xc3   : > { %v617_v19 = vstv %s616_s21  ;;  %v1502_v30 = vld [vmem:[#allocation14] sm:$0xff]   ;;  %v1506_v33 = vld [vmem:[#allocation15 + $0x28] sm:$0xff]   ;;  %v1509_v36 = vld [vmem:[#allocation15 + $0x10] sm:$0xff]   ;;  %v626_v61 = vsub.f32 %v2167_v15, %v2175_v18  ;;  %vm2209_vm1 = vcmp.lt.s32.totalorder %v929_v59, %v936_v0  ;;  %vm2213_vm2 = vcmp.lt.s32.totalorder %v930_v63, %v936_v0  ;;  %p1707_p7 = scmp.ne.s32.totalorder %s2200_s13, %s1706_s12  ;;  %s1710_s22 = sshll.u32 %s1856_s29, 4  ;;  %s1711_s22 = int_to_ptr.vmem [resolvable:$false] %s1710_s22 }
  0xc4   : > { %v618_v23 = vmul.f32 %v617_v19, %v2171_v16  ;;  %v619_v24 = vmul.f32 %v617_v19, %v2175_v18  ;;  %v1507_v34 = vld [vmem:[#allocation15 + $0x20] sm:$0xff]   ;;  %v1510_v37 = vld [vmem:[#allocation15 + $0x8] sm:$0xff]   ;;  %v1302_v40 = vld [vmem:[%s2144_s11] sm:$0xff]   ;;  %s1712_s15 = scalar_lea.vmem %s1711_s22, 512  ;;  %p1713_p0 = scmp.lt.s32.totalorder %s2200_s13, %s1711_s22 }
  0xc5   : > { %1310 = vmatpush3.bf16.msra.mxu0 %v1492_v6  ;;  %1339 = vmatpush3.bf16.msra.mxu1 %v1505_v32  ;;  %v1511_v38 = vld [vmem:[#allocation15] sm:$0xff]   ;;  %v1303_v44 = vunpack.c.l.bf16 %v1302_v40  ;;  %v1304_v49 = vunpack.c.h.bf16 %v1302_v40  ;;  %p2374_p1 = scmp.ne.s32.totalorder %s2368_s10, 0  ;;  %p1714_p4 = scmp.lt.s32.totalorder %s1712_s15, %s1706_s12 }
  0xc6   : > { %1311 = vmatprep.subr.bf16.mxu0 %v1493_v7  ;;  %v623_v28 = vadd.f32 %v621_v25, %v618_v23  ;;  %v624_v29 = vadd.f32 %v622_v26, %v619_v24  ;;  %1340 = vmatprep.subr.bf16.mxu1 %v1854_v3  ;;  %v1265_v41 = vld [vmem:[%s608_s8] ss:$0 sm:$0xff]  ;;  %s2207_s30 = scalar_lea.hbm %s2369_s23, %s1300_s27 }
  0xc7   : > { %p1708_p12 = pnand %p1707_p7, %p2374_p1  ;;  %p1715_p6 = por %p1714_p4, %p1713_p0 }
  0xc8   : > { %v627_v31 = vpack.c.bf16 %v624_v29, %v623_v28 }
  0xc9   : > { %1312 = vmatpush3.bf16.msra.mxu0 %v1494_v8  ;;  %1341 = vmatpush3.bf16.msra.mxu1 %v1506_v33  ;;  %p1709_p10 = pneg %p1708_p12 }
  0xca   : > { %1313 = vmatprep.subr.bf16.mxu0 %v1495_v9  ;;  %1342 = vmatprep.subr.bf16.mxu1 %v1854_v3 }
  0xcb   : > { %p1716_p8 = pnand %p1715_p6, %p1709_p10 }
  0xcd   : > { %1314 = vmatpush3.bf16.msra.mxu0 %v1496_v10  ;;  %1343 = vmatpush3.bf16.msra.mxu1 %v1507_v34 }
  0xce   : > { %1315 = vmatprep.subr.bf16.mxu0 %v1497_v11  ;;  %1344 = vmatprep.subr.bf16.mxu1 %v1854_v3 }
  0xd1   : > { %1316 = vmatpush3.bf16.msra.mxu0 %v1498_v13  ;;  %1345 = vmatpush3.bf16.msra.mxu1 %v1508_v35 }
  0xd2   : > { %1317 = vmatprep.subr.bf16.mxu0 %v1499_v17  ;;  %1346 = vmatprep.subr.bf16.mxu1 %v1854_v3 }
  0xd5   : > { %1318 = vmatpush3.bf16.msra.mxu0 %v1500_v22  ;;  %1347 = vmatpush3.bf16.msra.mxu1 %v1509_v36 }
  0xd6   : > { %1319 = vmatprep.subr.bf16.mxu0 %v1501_v27  ;;  %1348 = vmatprep.subr.bf16.mxu1 %v1854_v3 }
  0xd9   : > { %1320 = vmatpush3.bf16.msra.mxu0 %v1502_v30  ;;  %1349 = vmatpush3.bf16.msra.mxu1 %v1510_v37 }
  0xda   : > { %1350 = vmatprep.subr.bf16.mxu1 %v1854_v3 }
  0xdc   : > { %804 = vmatmul.mubr.bf16.vlgmr.msra.gmra.mxu0 %v627_v31 }
  0xdd   : > { %1351 = vmatpush3.bf16.msra.mxu1 %v1511_v38 }
 0x19c   : > { %v1321_v39 = vpop.f32.mrf.mxu0 }
 0x19e   : > { %v1322_v42 = vpop.f32.mrf.mxu0 }
 0x19f   : > { %v1323_v43 = vadd.f32 %v1322_v42, %v1321_v39 }
 0x1a0   : > { %v1324_v45 = vpop.f32.mrf.mxu0 }
 0x1a1   : > { %v806_v46 = vadd.f32 %v1323_v43, %v1265_v41 }
 0x1a2   : > { %v1325_v47 = vpop.f32.mrf.mxu0 }
 0x1a3   : > { %v1326_v48 = vadd.f32 %v1325_v47, %v1324_v45  ;;  %v816_v50 = vadd.f32 %v1303_v44, %v806_v46 }
 0x1a5   : > { %v809_v51 = vadd.f32 %v1326_v48, %v1265_v41  ;;  %1512 = vtanh.f32 %v816_v50 }
 0x1a7   : > { %v817_v52 = vadd.f32 %v1304_v49, %v809_v51 }
 0x1a9   : > { %1514 = vtanh.f32 %v817_v52 }
 0x1b2   : > { %v1513_v53 = vpop.eup %1512 }
 0x1b6   : > { %v1515_v54 = vpop.eup %1514 }
 0x1b7   : > { %v820_v55 = vpack.c.bf16 %v1515_v54, %v1513_v53 }
 0x1b9   : > { %1353 = vmatmul.mubr.bf16.vlgmr.msra.gmra.mxu1 %v820_v55 }
 0x279   : > { %v919_v58 = vpop.f32.mrf.mxu1 }
 0x27a   : > { %926 = vst [vmem:[%s595_s26] sm:$0xff] %v919_v58  ;;  %v939_v60 = vsub.f32 %v919_v58, %v625_v57 }
 0x27b   : > { %v1354_v62 = vpop.f32.mrf.mxu1 }
 0x27c   : > { %v941_v2 = vmul.f32 %v939_v60, %v939_v60 }
 0x27d   : > { %v922_v1 = vpop.f32.mrf.mxu1 }
 0x27e   : > { %927 = vst [vmem:[%s595_s26 + $0x8] sm:$0xff] %v922_v1  ;;  %v940_v3 = vsub.f32 %v922_v1, %v626_v61 }
 0x27f   : > { %v1355_v6 = vpop.f32.mrf.mxu1 }
 0x280   : > { %1719 = shalt.err (!%p1716_p8)
}
 0x281   : > { %s1720_s20 = scalar_lea.hbm %s2207_s30, 256  ;;  %s1724_s19 = scalar_lea.hbm %s2369_s23, 512 }
 0x282   : > { %p1721_p2 = scmp.ne.s32.totalorder %s2207_s30, %s1720_s20  ;;  %p1725_p9 = scmp.lt.s32.totalorder %s2207_s30, %s2369_s23 }
 0x283   : > { %p1726_p13 = scmp.lt.s32.totalorder %s1724_s19, %s1720_s20 }
 0x284   : > { %p1722_p3 = pnand %p1721_p2, %p2374_p1 }
 0x285   : > { %p1727_p5 = por %p1726_p13, %p1725_p9 }
 0x286   : > { %p1723_p11 = pneg %p1722_p3 }
 0x288   : > { %p1728_p7 = pnand %p1727_p5, %p1723_p11 }
 0x28a   : > { %1731 = shalt.err (!%p1728_p7)
}
 0x28b   : > { %s1857_s28 = smov 128   ;;  %s1858_s2 = smov 8   ;;  %v942_v7 = vmul.f32 %v940_v3, %v940_v3  ;;  %v947_v8 = vsel %vm2209_vm1, %v941_v2, 0.0 }
 0x28c   : > { %1380 = dma.vmem_to_hbm [thread:$0]  (%p2374_p1), %s2200_s13, 256, %s2207_s30, %s958_s25, %s1857_s28, %s1857_s28, %s1858_s2  }
 0x28d   : > { %v948_v9 = vsel %vm2213_vm2, %v942_v7, 0.0  ;;  %s1293_s8 = sshll.u32 %s1832_s16, 4  ;;  %s601_s24 = scalar_lea.vmem [#allocation18], %s2124_s0 }
 0x28e   : > { %v949_v10 = vadd.f32 %v948_v9, %v947_v8  ;;  %s994_s26 = sshll.u32 %s601_s24, 4  ;;  %s2375_s7 = sld [smem:[#allocation42_spill]]  ;;  %s995_s26 = int_to_ptr.vmem [resolvable:$true] %s994_s26 }
 0x28f   : > { %s963_s30 = scalar_lea.sflag [#allocation19], %s2124_s0  ;;  %s1732_s25 = scalar_lea.vmem %s995_s26, 16 }
 0x290   : > { %v950_v11 = vrot.slane %v949_v10, 4  ;;  %p1733_p12 = scmp.ne.s32.totalorder %s995_s26, %s1732_s25  ;;  %s1859_s12 = smov [#allocation18]  }
 0x291   : > { %s1736_s29 = sshll.u32 %s1859_s12, 4  ;;  %s1737_s29 = int_to_ptr.vmem [resolvable:$false] %s1736_s29 }
 0x292   : > { %v951_v12 = vadd.f32 %v950_v11, %v949_v10  ;;  %p1734_p10 = pnand %p1733_p12, %p2374_p1  ;;  %s1738_s16 = scalar_lea.vmem %s1737_s29, 32 }
 0x293   : > { %p1739_p4 = scmp.lt.s32.totalorder %s995_s26, %s1737_s29  ;;  %p1740_p6 = scmp.lt.s32.totalorder %s1738_s16, %s1732_s25 }
 0x294   : > { %v952_v13 = vrot.slane %v951_v12, 2  ;;  %s992_s9 = scalar_lea.hbm %s2375_s7, %s1293_s8  ;;  %p1735_p0 = pneg %p1734_p10 }
 0x295   : > { %p1741_p8 = por %p1740_p6, %p1739_p4 }
 0x296   : > { %v953_v14 = vadd.f32 %v952_v13, %v951_v12 }
 0x297   : > { %p1742_p2 = pnand %p1741_p8, %p1735_p0 }
 0x298   : > { %v954_v15 = vrot.slane %v953_v14, 1 }
 0x29a   : > { %v955_v16 = vadd.f32 %v954_v15, %v953_v14 }
 0x29c   : > { %956 = vst [vmem:[%s601_s24] sm:$0x1] %v955_v16 }
 0x29d   : > { %1745 = shalt.err (!%p1742_p2)
}
 0x29e   : > { %s1746_s22 = scalar_lea.hbm %s992_s9, 16  ;;  %s1750_s20 = scalar_lea.hbm %s2375_s7, 32 }
 0x29f   : > { %p1747_p3 = scmp.ne.s32.totalorder %s992_s9, %s1746_s22  ;;  %p1751_p13 = scmp.lt.s32.totalorder %s992_s9, %s2375_s7 }
 0x2a0   : > { %p1752_p5 = scmp.lt.s32.totalorder %s1750_s20, %s1746_s22 }
 0x2a1   : > { %p1748_p11 = pnand %p1747_p3, %p2374_p1 }
 0x2a2   : > { %p1753_p7 = por %p1752_p5, %p1751_p13 }
 0x2a3   : > { %p1749_p9 = pneg %p1748_p11 }
 0x2a5   : > { %p1754_p12 = pnand %p1753_p7, %p1749_p9 }
 0x2a7   : > { %1757 = shalt.err (!%p1754_p12)
}
 0x2a8   : > { %1381 = dma.vmem_to_hbm [thread:$0]  (%p2374_p1), %s995_s26, 16, %s992_s9, %s963_s30  }
 0x2a9 PF: > { %s2376_s19 = sld [smem:[#allocation29_spill]]  ;;  %p2379_p0 = scmp.ge.s32.totalorder %s1840_s18, 2 }
 0x2aa   : > { %s2377_s21 = sld [smem:[#allocation31_spill]] }
 0x2af   : > { %s1006_s1 = sand.u32 1, %s2376_s19  }
 0x2b0   : > { %p2378_p10 = scmp.ne.s32.totalorder %s2377_s21, 0  ;;  %s1007_s28 = scalar_lea.sflag [#allocation4], %s1006_s1 }
 0x2b2   : > { %p1411_p4 = pnand %p2379_p0, %p2378_p10 }
 0x2b4   : > { %p1412_p6 = pneg %p1411_p4 }
 0x2b6   : > { %1811 = dma.done.wait (%p1412_p6), %s1007_s28, 256  }
 0x2b7   : > { %1813 = vsyncadd (%p1412_p6), %s1007_s28, 4294967040  ;;  %s1016_s2 = scalar_lea.sflag [#allocation19], %s1006_s1 }
 0x2b8   : > { %1815 = dma.done.wait (%p1412_p6), %s1016_s2, 16  }
 0x2b9   : > { %1817 = vsyncadd (%p1412_p6), %s1016_s2, 4294967280  ;;  %s39_s18 = sadd.s32 1, %s1840_s18   ;;  %s2380_s10 = sld [smem:[#allocation30_spill]] }
 0x2ba   : > { %p36_p8 = scmp.ge.s32.totalorder %s39_s18, 4   ;;  %s2381_s15 = sld [smem:[#allocation34_spill]] }
 0x2bb   : > { %s2382_s8 = sld [smem:[#allocation32_spill]]  ;;  %s2383_s13 = smov %s1824_s14 }
 0x2bc   : > { %s2385_s16 = smov %s1836_s17 }
 0x2bd   :  { %38 = sbr.rel (!%p36_p8) target bundleno = 24 (0x18), region = 176 }
 0x2bf   : > { %s2384_s14 = smov %s2380_s10 }
 0x2c1   : > { %s2386_s17 = smov %s2382_s8 }
 0x2c2   :  { %1020 = vsyncpa [#allocation3], 1 }
 0x2c3   :  { %1022 = vsyncpa [#allocation3 + $0x1], 1 }
 0x2c4   :  { %1023 = vsyncpa [#allocation10], 1 }
 0x2c5   :  { %1025 = vsyncpa [#allocation10 + $0x1], 1 }
 0x2c6   :  { %1026 = vsyncpa [#allocation13], 1 }
 0x2c7   :  { %1028 = vsyncpa [#allocation13 + $0x1], 1 }
 0x2c8   :  { %1029 = vsyncpa [#allocation16], 1 }
 0x2c9   :  { %1030 = vsyncpa [#allocation4], 1 }
 0x2ca   :  { %1032 = vsyncpa [#allocation4 + $0x1], 1 }
 0x2cb   :  { %1033 = vsyncpa [#allocation19], 1 }
 0x2cc   :  { %1035 = vsyncpa [#allocation19 + $0x1], 1 }
 0x2cd   :  { %1036 = vsyncpa [#allocation5], 1 }
 0x2ce   :  { %1038 = vsyncpa [#allocation5 + $0x1], 1 }
 0x2cf   :  { %1039 = vsyncpa [#allocation6], 1 }
 0x2d0   :  { %1041 = vsyncpa [#allocation6 + $0x1], 1 }

</bundles_post_ra>
